<compile_context>
chip_gen: v7x
topology: tpu7x:2x2x1
jax: 0.10.0
libtpu: 0.0.40
codegen_flags: <defaults>
</compile_context>

<pallas_src>
import jax
import jax.numpy as jnp
from jax.experimental import pallas as pl
from jax.experimental.pallas import tpu as pltpu  # noqa: F401  (TPU backend)

LANE = 128


def _align(v, m):
    return ((v + m - 1) // m) * m


def _make_gcn_kernel(nfeat, w2_row, pad, b2_row):
    """Builds the kernel with static packed-parameter offsets baked in."""

    def gcn_kernel(x_ref, adj_ref, w_ref, b_ref, o_ref):
        x = x_ref[...]                          # (N, nfeat)   bf16
        adj = adj_ref[...]                      # (N, N)       bf16
        w1 = w_ref[0:nfeat, :]                  # (nfeat, PAD) bf16  (cols >= nhid are 0)
        w2 = w_ref[w2_row:w2_row + pad, :]      # (PAD, PAD)   bf16  (rows >= nhid / cols >= nclass are 0)
        b1 = b_ref[0:1, :]                      # (1, PAD)     f32   (cols >= nhid are 0)
        b2 = b_ref[b2_row:b2_row + 1, :]        # (1, PAD)     f32   (cols >= nclass are 0)

        # Layer 1: support = x @ W1 ; h = relu(adj @ support + b1)
        s1 = jnp.dot(x, w1, preferred_element_type=jnp.float32)
        h = jnp.dot(adj, s1.astype(jnp.bfloat16),
                    preferred_element_type=jnp.float32) + b1
        h = jnp.maximum(h, 0.0)

        # TODO(synk): F.dropout with training=True would need pltpu.prng_random_bits;
        # inference mode (training=False) makes it an identity, which we implement.

        # Layer 2: support = h @ W2 ; z = adj @ support + b2
        s2 = jnp.dot(h.astype(jnp.bfloat16), w2,
                     preferred_element_type=jnp.float32)
        z = jnp.dot(adj, s2.astype(jnp.bfloat16),
                    preferred_element_type=jnp.float32) + b2

        # Sigmoid = 1 / (1 + exp(-z)); exp and approx-reciprocal both live on the EUP.
        o_ref[...] = pl.reciprocal(1.0 + jnp.exp(-z), approx=True)

    return gcn_kernel


def gcn_forward(x, adj, w1, b1, w2, b2):
    n, nfeat = x.shape
    nhid = w1.shape[1]
    nclass = w2.shape[1]

    # Pad hidden and class dims to a common lane-dense width (multiple of 128).
    pad = _align(max(nhid, nclass), LANE)
    w2_row = _align(nfeat, 16)   # bf16 sublane packing alignment for W2's row offset
    b2_row = 8                   # f32 sublane alignment for b2's row offset

    # Packed bf16 weight slab: [0:nfeat) = W1 (padded), [w2_row:w2_row+pad) = W2 (padded).
    w_packed = jnp.zeros((w2_row + pad, pad), jnp.bfloat16)
    w_packed = w_packed.at[0:nfeat, 0:nhid].set(w1.astype(jnp.bfloat16))
    w_packed = w_packed.at[w2_row:w2_row + nhid, 0:nclass].set(w2.astype(jnp.bfloat16))

    # Packed f32 bias slab: row 0 = b1, row 8 = b2 (zero-padded lanes).
    b_packed = jnp.zeros((16, pad), jnp.float32)
    b_packed = b_packed.at[0:1, 0:nhid].set(b1.astype(jnp.float32))
    b_packed = b_packed.at[b2_row:b2_row + 1, 0:nclass].set(b2.astype(jnp.float32))

    x_bf = x.astype(jnp.bfloat16)
    adj_bf = adj.astype(jnp.bfloat16)

    full = lambda shape: pl.BlockSpec(shape, lambda: (0,) * len(shape))
    kernel = _make_gcn_kernel(nfeat, w2_row, pad, b2_row)

    out = pl.pallas_call(
        kernel,
        out_shape=jax.ShapeDtypeStruct((n, pad), jnp.float32),
        grid=(),
        in_specs=[
            full(x_bf.shape),
            full(adj_bf.shape),
            full(w_packed.shape),
            full(b_packed.shape),
        ],
        out_specs=full((n, pad)),
    )(x_bf, adj_bf, w_packed, b_packed)

    # output = torch.reshape(x, (adj.shape[0], -1))
    return out[:, :nclass].reshape(adj.shape[0], -1)


def _reference(x, adj, w1, b1, w2, b2):
    h = jnp.maximum(adj @ (x @ w1) + b1, 0.0)
    z = adj @ (h @ w2) + b2
    return jax.nn.sigmoid(z).reshape(adj.shape[0], -1)


if __name__ == "__main__":
    # Small shapes implied by the module: N nodes, nfeat -> nhid -> nclass.
    N, nfeat, nhid, nclass = 16, 32, 32, 8

    key = jax.random.PRNGKey(0)
    kx, ka, kw1, kb1, kw2, kb2 = jax.random.split(key, 6)

    x = jax.random.normal(kx, (N, nfeat), dtype=jnp.float32)

    # Symmetric, self-looped, row-normalized adjacency (typical GCN input).
    a_raw = (jax.random.uniform(ka, (N, N)) > 0.7).astype(jnp.float32)
    a_sym = jnp.clip(a_raw + a_raw.T + jnp.eye(N, dtype=jnp.float32), 0.0, 1.0)
    adj = a_sym / jnp.sum(a_sym, axis=1, keepdims=True)

    # Deterministic parameter init (uniform(-stdv, stdv), stdv = 1/sqrt(out_feat)),
    # matching the usual GraphConvolutionLayer reset_parameters().
    stdv1 = 1.0 / jnp.sqrt(jnp.float32(nhid))
    stdv2 = 1.0 / jnp.sqrt(jnp.float32(nclass))
    w1 = jax.random.uniform(kw1, (nfeat, nhid), minval=-stdv1, maxval=stdv1,
                            dtype=jnp.float32)
    b1 = jax.random.uniform(kb1, (1, nhid), minval=-stdv1, maxval=stdv1,
                            dtype=jnp.float32)
    w2 = jax.random.uniform(kw2, (nhid, nclass), minval=-stdv2, maxval=stdv2,
                            dtype=jnp.float32)
    b2 = jax.random.uniform(kb2, (1, nclass), minval=-stdv2, maxval=stdv2,
                            dtype=jnp.float32)

    out = gcn_forward(x, adj, w1, b1, w2, b2)
    jax.block_until_ready(out)

    ref = _reference(x, adj, w1, b1, w2, b2)
    assert out.shape == (N, nclass), out.shape
    # Tolerance loosened vs. pure-f32: bf16 MXU operands + approx-reciprocal sigmoid.
    assert jnp.allclose(out, ref, atol=2e-2, rtol=0.0), "mismatch vs reference"

    print("KERNEL_OK")
</pallas_src>

<mosaic_0001>
module attributes {stable_mosaic.version = 11 : i64} {
  func.func @gcn_kernel(%arg0: memref<16x32xbf16, #tpu.memory_space<vmem>>, %arg1: memref<16x16xbf16, #tpu.memory_space<vmem>>, %arg2: memref<160x128xbf16, #tpu.memory_space<vmem>>, %arg3: memref<16x128xf32, #tpu.memory_space<vmem>>, %arg4: memref<16x128xf32, #tpu.memory_space<vmem>>) attributes {dimension_semantics = [], scalar_prefetch = 0 : i64, scratch_operands = 0 : i64, tpu.core_type = #tpu.core_type<tc>} {
    %c0 = arith.constant 0 : index
    %c0_0 = arith.constant 0 : index
    %0 = vector.load %arg0[%c0, %c0_0] : memref<16x32xbf16, #tpu.memory_space<vmem>>, vector<16x32xbf16>
    %c0_1 = arith.constant 0 : index
    %c0_2 = arith.constant 0 : index
    %1 = vector.load %arg1[%c0_1, %c0_2] : memref<16x16xbf16, #tpu.memory_space<vmem>>, vector<16x16xbf16>
    %c0_3 = arith.constant 0 : index
    %c0_4 = arith.constant 0 : index
    %2 = vector.load %arg2[%c0_3, %c0_4] : memref<160x128xbf16, #tpu.memory_space<vmem>>, vector<32x128xbf16>
    %c32 = arith.constant 32 : index
    %c0_5 = arith.constant 0 : index
    %3 = vector.load %arg2[%c32, %c0_5] : memref<160x128xbf16, #tpu.memory_space<vmem>>, vector<128x128xbf16>
    %c0_6 = arith.constant 0 : index
    %c0_7 = arith.constant 0 : index
    %4 = vector.load %arg3[%c0_6, %c0_7] : memref<16x128xf32, #tpu.memory_space<vmem>>, vector<1x128xf32>
    %c8 = arith.constant 8 : index
    %c0_8 = arith.constant 0 : index
    %5 = vector.load %arg3[%c8, %c0_8] : memref<16x128xf32, #tpu.memory_space<vmem>>, vector<1x128xf32>
    %cst = arith.constant dense<0.000000e+00> : vector<16x128xf32>
    %6 = tpu.matmul %0, %2, %cst {dimension_numbers = #tpu.dot_dimension_numbers<[1], [0], [0], [1], [0, 0, 1, 1], [], []>} : vector<16x32xbf16>, vector<32x128xbf16>, vector<16x128xf32> -> vector<16x128xf32>
    %7 = arith.truncf %6 : vector<16x128xf32> to vector<16x128xbf16>
    %cst_9 = arith.constant dense<0.000000e+00> : vector<16x128xf32>
    %8 = tpu.matmul %1, %7, %cst_9 {dimension_numbers = #tpu.dot_dimension_numbers<[1], [0], [0], [1], [0, 0, 1, 1], [], []>} : vector<16x16xbf16>, vector<16x128xbf16>, vector<16x128xf32> -> vector<16x128xf32>
    %9 = vector.broadcast %4 : vector<1x128xf32> to vector<16x128xf32>
    %10 = arith.addf %8, %9 : vector<16x128xf32>
    %cst_10 = arith.constant 0.000000e+00 : f32
    %11 = vector.broadcast %cst_10 : f32 to vector<16x128xf32>
    %12 = arith.maximumf %10, %11 : vector<16x128xf32>
    %13 = arith.truncf %12 : vector<16x128xf32> to vector<16x128xbf16>
    %cst_11 = arith.constant dense<0.000000e+00> : vector<16x128xf32>
    %14 = tpu.matmul %13, %3, %cst_11 {dimension_numbers = #tpu.dot_dimension_numbers<[1], [0], [0], [1], [0, 0, 1, 1], [], []>} : vector<16x128xbf16>, vector<128x128xbf16>, vector<16x128xf32> -> vector<16x128xf32>
    %15 = arith.truncf %14 : vector<16x128xf32> to vector<16x128xbf16>
    %cst_12 = arith.constant dense<0.000000e+00> : vector<16x128xf32>
    %16 = tpu.matmul %1, %15, %cst_12 {dimension_numbers = #tpu.dot_dimension_numbers<[1], [0], [0], [1], [0, 0, 1, 1], [], []>} : vector<16x16xbf16>, vector<16x128xbf16>, vector<16x128xf32> -> vector<16x128xf32>
    %17 = vector.broadcast %5 : vector<1x128xf32> to vector<16x128xf32>
    %18 = arith.addf %16, %17 : vector<16x128xf32>
    %cst_13 = arith.constant 0.000000e+00 : f32
    %19 = vector.broadcast %cst_13 : f32 to vector<16x128xf32>
    %20 = arith.subf %19, %18 : vector<16x128xf32>
    %21 = math.exp %20 : vector<16x128xf32>
    %cst_14 = arith.constant 1.000000e+00 : f32
    %22 = vector.broadcast %cst_14 : f32 to vector<16x128xf32>
    %23 = arith.addf %22, %21 : vector<16x128xf32>
    %24 = tpu.reciprocal %23 {approx = true} : vector<16x128xf32> -> vector<16x128xf32>
    %c0_15 = arith.constant 0 : index
    %c0_16 = arith.constant 0 : index
    %25 = vector.load %arg4[%c0_15, %c0_16] : memref<16x128xf32, #tpu.memory_space<vmem>>, vector<16x128xf32>
    tpu.vector_store %arg4[%c0_15, %c0_16], %24 {strides = array<i32>} : memref<16x128xf32, #tpu.memory_space<vmem>>, vector<16x128xf32>,
    return
  }
}

</mosaic_0001>

<bundles_post_ra>
// kernel: tpu_custom_call.1
= control target key start
LH: loop header
LB: loop body
LE: loop exit
PB: predicated region body
PF: predicated region fallthrough
CT: control target
= control target key end

     0   :  { %9 = vsyncpa [#allocation3], 0  ;;  %s739_s0 = inlined_call_operand.hbm [shape: bf16[16,32], index: 0, kind: input, shape index: {}]   ;;  %s740_s1 = inlined_call_operand.hbm [shape: bf16[16,16], index: 1, kind: input, shape index: {}]   ;;  %s741_s2 = inlined_call_operand.hbm [shape: bf16[160,128], index: 2, kind: input, shape index: {}]   ;;  %s742_s3 = inlined_call_operand.hbm [shape: f32[16,128], index: 3, kind: input, shape index: {}]   ;;  %s743_s4 = inlined_call_operand.hbm [shape: f32[16,128], index: 4, kind: output, shape index: {}]  }
   0x1   :  { %10 = vsyncpa [#allocation6], 0 }
   0x2   :  { %11 = vsyncpa [#allocation9], 0 }
   0x3   :  { %12 = vsyncpa [#allocation4], 0  ;;  %s608_s15 = smov [#allocation5]   ;;  %s609_s17 = smov [#allocation2]  }
   0x4   :  { %s30_s16 = sshll.u32 %s608_s15, 4  ;;  %s18_s18 = sshll.u32 %s609_s17, 4  ;;  %s31_s16 = int_to_ptr.vmem [resolvable:$true] %s30_s16  ;;  %s644_s18 = int_to_ptr.vmem [resolvable:$true] %s18_s18 }
   0x5   :  { %s490_s21 = scalar_lea.hbm %s740_s1, 128 }
   0x6   :  { %p491_p0 = scmp.ne.s32.totalorder %s740_s1, %s490_s21  ;;  %p494_p1 = scmp.lt.u32.totalorder %s490_s21, %s740_s1 }
   0x8   :  { %p496_p2 = pnand %p494_p1, %p491_p0 }
   0xa   :  { %499 = shalt.err (!%p496_p2)
}
   0xb   :  { %s500_s26 = scalar_lea.vmem %s31_s16, 128  ;;  %p505_p4 = scmp.lt.s32.totalorder %s31_s16, %s31_s16 }
   0xc   :  { %p501_p3 = scmp.ne.s32.totalorder %s31_s16, %s500_s26  ;;  %p506_p5 = scmp.lt.s32.totalorder %s500_s26, %s500_s26 }
   0xe   :  { %p507_p6 = por %p506_p5, %p505_p4 }
  0x10   :  { %p508_p7 = pnand %p507_p6, %p501_p3 }
  0x12   :  { %511 = shalt.err (!%p508_p7)
}
  0x13   :  { %s610_s27 = smov 64   ;;  %s611_s28 = smov 4  }
  0x14   :  { %36 = dma.hbm_to_vmem [thread:$0]  %s740_s1, 128, %s31_s16, [#allocation6], %s610_s27, %s610_s27, %s611_s28  }
  0x15   :  { %s512_s7 = scalar_lea.hbm %s739_s0, 128 }
  0x16   :  { %p513_p8 = scmp.ne.s32.totalorder %s739_s0, %s512_s7  ;;  %p516_p9 = scmp.lt.u32.totalorder %s512_s7, %s739_s0 }
  0x18   :  { %p518_p10 = pnand %p516_p9, %p513_p8 }
  0x1a   :  { %521 = shalt.err (!%p518_p10)
}
  0x1b   :  { %s522_s12 = scalar_lea.vmem %s644_s18, 128  ;;  %p527_p12 = scmp.lt.s32.totalorder %s644_s18, %s644_s18 }
  0x1c   :  { %p523_p11 = scmp.ne.s32.totalorder %s644_s18, %s522_s12  ;;  %p528_p13 = scmp.lt.s32.totalorder %s522_s12, %s522_s12 }
  0x1e   :  { %p529_p0 = por %p528_p13, %p527_p12 }
  0x20   :  { %p530_p1 = pnand %p529_p0, %p523_p11 }
  0x22   :  { %533 = shalt.err (!%p530_p1)
}
  0x23   :  { %24 = dma.hbm_to_vmem [thread:$0]  %s739_s0, 128, %s644_s18, [#allocation3], %s610_s27, %s610_s27, %s611_s28  }
  0x24   :  { %s612_s14 = smov [#allocation7]   ;;  %s613_s16 = smov [#allocation8]  }
  0x25   :  { %s42_s15 = sshll.u32 %s612_s14, 4  ;;  %s54_s17 = sshll.u32 %s613_s16, 4  ;;  %s43_s15 = int_to_ptr.vmem [resolvable:$true] %s42_s15  ;;  %s681_s17 = int_to_ptr.vmem [resolvable:$true] %s54_s17 }
  0x26   :  { %s534_s21 = scalar_lea.hbm %s741_s2, 1280 }
  0x27   :  { %p535_p2 = scmp.ne.s32.totalorder %s741_s2, %s534_s21  ;;  %p538_p3 = scmp.lt.u32.totalorder %s534_s21, %s741_s2 }
  0x29   :  { %p540_p4 = pnand %p538_p3, %p535_p2 }
  0x2b   :  { %543 = shalt.err (!%p540_p4)
}
  0x2c   :  { %s544_s0 = scalar_lea.vmem %s43_s15, 1280  ;;  %p549_p6 = scmp.lt.s32.totalorder %s43_s15, %s43_s15 }
  0x2d   :  { %p545_p5 = scmp.ne.s32.totalorder %s43_s15, %s544_s0  ;;  %p550_p7 = scmp.lt.s32.totalorder %s544_s0, %s544_s0 }
  0x2f   :  { %p551_p8 = por %p550_p7, %p549_p6 }
  0x31   :  { %p552_p9 = pnand %p551_p8, %p545_p5 }
  0x33   :  { %555 = shalt.err (!%p552_p9)
}
  0x34   :  { %48 = dma.hbm_to_vmem [thread:$0]  %s741_s2, 1280, %s43_s15, [#allocation6], %s610_s27, %s610_s27, %s611_s28  }
  0x35   :  { %s556_s5 = scalar_lea.hbm %s742_s3, 256 }
  0x36   :  { %p557_p10 = scmp.ne.s32.totalorder %s742_s3, %s556_s5  ;;  %p560_p11 = scmp.lt.u32.totalorder %s556_s5, %s742_s3 }
  0x38   :  { %p562_p12 = pnand %p560_p11, %p557_p10 }
  0x3a   :  { %565 = shalt.err (!%p562_p12)
}
  0x3b   :  { %s566_s10 = scalar_lea.vmem %s681_s17, 256  ;;  %p571_p0 = scmp.lt.s32.totalorder %s681_s17, %s681_s17 }
  0x3c   :  { %p567_p13 = scmp.ne.s32.totalorder %s681_s17, %s566_s10  ;;  %p572_p1 = scmp.lt.s32.totalorder %s566_s10, %s566_s10 }
  0x3e   :  { %p573_p2 = por %p572_p1, %p571_p0 }
  0x40   :  { %p574_p3 = pnand %p573_p2, %p567_p13 }
  0x42   :  { %577 = shalt.err (!%p574_p3)
}
  0x43   :  { %s614_s2 = smov 128   ;;  %s615_s27 = smov 8  }
  0x44   :  { %60 = dma.hbm_to_vmem [thread:$0]  %s742_s3, 256, %s681_s17, [#allocation9], %s614_s2, %s614_s2, %s615_s27  }
  0x45   :  { %600 = dma.done.wait [#allocation3], 128  }
  0x46   :  { %601 = vsyncadd [#allocation3], 4294967168 }
  0x47   :  { %602 = dma.done.wait [#allocation6], 1408  }
  0x48   :  { %603 = vsyncadd [#allocation6], 4294965888 }
  0x49   :  { %604 = dma.done.wait [#allocation9], 256  }
  0x4a   :  { %605 = vsyncadd [#allocation9], 4294967040  ;;  %v616_v0 = vmov 0.0   ;;  %vm617_vm0 = vmmov 0   ;;  %v470_v1 = vld [vmem:[#allocation7] sm:$0xff]   ;;  %v471_v2 = vld [vmem:[#allocation7 + $0x8] sm:$0xff]  }
  0x4b   :  { %419 = vmatprep.subr.bf16.mxu0 %v616_v0  ;;  %423 = vmatprep.mubr.msk.bf16.mxu0 %vm617_vm0, %v616_v0  ;;  %vm117_vm1 = vcmask 261120   ;;  %v472_v3 = vld [vmem:[#allocation2] sm:$0xff]   ;;  %v475_v5 = vld [vmem:[#allocation7 + $0x18] sm:$0xff]   ;;  %v476_v6 = vld [vmem:[#allocation7 + $0x20] sm:$0xff]   ;;  %vm172_vm2 = vcmask 130048   ;;  %s618_s3 = smov [#allocation10]  }
  0x4c   :  { %433 = vmatprep.subr.bf16.mxu1 %v616_v0  ;;  %449 = vmatprep.mubr.msk.bf16.mxu1 %vm617_vm0, %v616_v0  ;;  %v474_v4 = vld [vmem:[#allocation7 + $0x10] sm:$0xff]   ;;  %v477_v7 = vld [vmem:[#allocation7 + $0x28] sm:$0xff]   ;;  %v479_v9 = vld [vmem:[#allocation7 + $0x38] sm:$0xff]   ;;  %s372_s12 = sshll.u32 %s618_s3, 4  ;;  %s373_s12 = int_to_ptr.vmem [resolvable:$true] %s372_s12 }
  0x4d   :  { %420 = vmatpush3.bf16.msra.mxu0 %v470_v1  ;;  %434 = vmatpush3.bf16.msra.mxu1 %v474_v4  ;;  %v478_v8 = vld [vmem:[#allocation7 + $0x30] sm:$0xff]   ;;  %v473_v15 = vld [vmem:[#allocation5] sm:$0xff]   ;;  %v480_v16 = vld [vmem:[#allocation7 + $0x40] sm:$0xff]   ;;  %s578_s1 = scalar_lea.vmem %s373_s12, 256  ;;  %p583_p5 = scmp.lt.s32.totalorder %s373_s12, %s373_s12 }
  0x4e   :  { %421 = vmatprep.subr.bf16.mxu0 %v616_v0  ;;  %435 = vmatprep.subr.bf16.mxu1 %v616_v0  ;;  %v481_v17 = vld [vmem:[#allocation7 + $0x48] sm:$0xff]   ;;  %v390_v18 = vld [vmem:[#allocation8] ss:$0 sm:$0xff]  ;;  %v401_v33 = vld [vmem:[#allocation8 + $0x8] ss:$0 sm:$0xff]  ;;  %p579_p4 = scmp.ne.s32.totalorder %s373_s12, %s578_s1  ;;  %p584_p6 = scmp.lt.s32.totalorder %s578_s1, %s578_s1 }
  0x50   :  { %p585_p7 = por %p584_p6, %p583_p5 }
  0x51   :  { %422 = vmatpush3.bf16.msra.mxu0 %v471_v2  ;;  %436 = vmatpush3.bf16.msra.mxu1 %v475_v5 }
  0x52   :  { %427 = vmatprep.subr.bf16.mxu0 %v616_v0  ;;  %437 = vmatprep.subr.bf16.mxu1 %v616_v0  ;;  %p586_p8 = pnand %p585_p7, %p579_p4 }
  0x54   :  { %424 = vmatmul.mubr.msk.bf16.vlgmr.msra.gmra.mrb[0].mxu0 %vm117_vm1, %v472_v3 }
  0x55   :  { %429 = vmatprep.mubr.msk.bf16.mxu0 %vm617_vm0, %v616_v0  ;;  %438 = vmatpush3.bf16.msra.mxu1 %v476_v6 }
  0x56   :  { %439 = vmatprep.subr.bf16.mxu1 %v616_v0 }
  0x59   :  { %440 = vmatpush3.bf16.msra.mxu1 %v477_v7 }
  0x5a   :  { %441 = vmatprep.subr.bf16.mxu1 %v616_v0 }
  0x5d   :  { %442 = vmatpush3.bf16.msra.mxu1 %v478_v8 }
  0x5e   :  { %443 = vmatprep.subr.bf16.mxu1 %v616_v0 }
  0x61   :  { %444 = vmatpush3.bf16.msra.mxu1 %v479_v9 }
  0x62   :  { %445 = vmatprep.subr.bf16.mxu1 %v616_v0 }
  0x65   :  { %446 = vmatpush3.bf16.msra.mxu1 %v480_v16 }
  0x66   :  { %447 = vmatprep.subr.bf16.mxu1 %v616_v0 }
  0x69   :  { %448 = vmatpush3.bf16.msra.mxu1 %v481_v17 }
 0x127   :  { %v155_v10 = vpop.f32.mrb[0].mxu0 }
 0x128   :  { %v425_v11 = vpop.f32.mrb[1].mxu0 }
 0x129   :  { %v158_v12 = vpop.f32.mrb[2].mxu0 }
 0x12a   :  { %v162_v13 = vpack.c.bf16 %v158_v12, %v155_v10  ;;  %v426_v14 = vpop.f32.mrb[3].mxu0 }
 0x12c   :  { %428 = vmatpush3.bf16.msra.mxu0 %v162_v13 }
 0x12d   :  { %453 = vmatprep.subr.bf16.mxu0 %v616_v0 }
 0x12f   :  { %430 = vmatmul.mubr.msk.bf16.vlgmr.msra.gmra.mrb[4].mxu0 %vm172_vm2, %v473_v15 }
 0x130   :  { %455 = vmatprep.mubr.msk.bf16.mxu0 %vm617_vm0, %v616_v0 }
 0x202   :  { %v210_v19 = vpop.f32.mrb[4].mxu0 }
 0x203   :  { %v211_v20 = vadd.f32 %v390_v18, %v210_v19  ;;  %v431_v21 = vpop.f32.mrb[5].mxu0 }
 0x204   :  { %v213_v22 = vpop.f32.mrb[6].mxu0 }
 0x205   :  { %v214_v23 = vadd.f32 %v390_v18, %v213_v22  ;;  %v432_v24 = vpop.f32.mrb[7].mxu0  ;;  %v217_v25 = vmax.f32 %v211_v20, 0.0 }
 0x207   :  { %v218_v26 = vmax.f32 %v214_v23, 0.0 }
 0x209   :  { %v219_v27 = vpack.c.bf16 %v218_v26, %v217_v25 }
 0x20b   :  { %450 = vmatmul.mubr.bf16.vlgmr.msra.gmra.mrb[0].mxu1 %v219_v27 }
 0x2de   :  { %v302_v28 = vpop.f32.mrb[0].mxu1 }
 0x2df   :  { %v451_v29 = vpop.f32.mrb[1].mxu1 }
 0x2e0   :  { %v305_v30 = vpop.f32.mrb[2].mxu1 }
 0x2e1   :  { %v309_v31 = vpack.c.bf16 %v305_v30, %v302_v28  ;;  %v452_v32 = vpop.f32.mrb[3].mxu1 }
 0x2e3   :  { %454 = vmatpush3.bf16.msra.mxu0 %v309_v31 }
 0x2e6   :  { %456 = vmatmul.mubr.msk.bf16.vlgmr.msra.gmra.mrb[8].mxu0 %vm172_vm2, %v473_v15 }
 0x3b9   :  { %v348_v34 = vpop.f32.mrb[8].mxu0 }
 0x3ba   :  { %v349_v35 = vadd.f32 %v401_v33, %v348_v34  ;;  %v457_v36 = vpop.f32.mrb[9].mxu0 }
 0x3bb   :  { %v351_v37 = vpop.f32.mrb[10].mxu0 }
 0x3bc   :  { %v355_v38 = vsub.f32 0.0, %v349_v35  ;;  %v352_v39 = vadd.f32 %v401_v33, %v351_v37  ;;  %v458_v40 = vpop.f32.mrb[11].mxu0 }
 0x3be   :  { %v357_v41 = vmul.f32 1.442695, %v355_v38  ;;  %v356_v42 = vsub.f32 0.0, %v352_v39 }
 0x3c0   :  { %482 = vpow2.f32 %v357_v41  ;;  %v359_v43 = vmul.f32 1.442695, %v356_v42 }
 0x3c2   :  { %484 = vpow2.f32 %v359_v43 }
 0x3ca   :  { %v483_v44 = vpop.eup %482 }
 0x3cb   :  { %v361_v45 = vadd.f32 1.0, %v483_v44 }
 0x3cc   :  { %v485_v46 = vpop.eup %484 }
 0x3cd   :  { %486 = vrcp.f32 %v361_v45  ;;  %v362_v47 = vadd.f32 1.0, %v485_v46 }
 0x3cf   :  { %488 = vrcp.f32 %v362_v47 }
 0x3d7   :  { %v487_v48 = vpop.eup %486 }
 0x3d8   :  { %365 = vst [vmem:[#allocation10] sm:$0xff] %v487_v48 }
 0x3d9   :  { %v489_v49 = vpop.eup %488 }
 0x3da   :  { %366 = vst [vmem:[#allocation10 + $0x8] sm:$0xff] %v489_v49 }
 0x3db   :  { %589 = shalt.err (!%p586_p8)
}
 0x3dc   :  { %s590_s15 = scalar_lea.hbm %s743_s4, 256 }
 0x3dd   :  { %p591_p9 = scmp.ne.s32.totalorder %s743_s4, %s590_s15  ;;  %p594_p10 = scmp.lt.u32.totalorder %s590_s15, %s743_s4 }
 0x3df   :  { %p596_p11 = pnand %p594_p10, %p591_p9 }
 0x3e1   :  { %599 = shalt.err (!%p596_p11)
}
 0x3e2   :  { %378 = dma.vmem_to_hbm [thread:$0]  %s373_s12, 256, %s743_s4, [#allocation4], %s614_s2, %s614_s2, %s615_s27  }
 0x3e3   :  { %606 = dma.done.wait [#allocation4], 256  }
 0x3e4   :  { %607 = vsyncadd [#allocation4], 4294967040 }
 0x3e5   :  { %382 = vsyncpa [#allocation3], 1 }
 0x3e6   :  { %383 = vsyncpa [#allocation6], 1 }
 0x3e7   :  { %384 = vsyncpa [#allocation9], 1 }
 0x3e8   :  { %385 = vsyncpa [#allocation4], 1 }

</bundles_post_ra>
